<compile_context>
chip_gen: v7x
topology: tpu7x:2x2x1
jax: 0.10.0
libtpu: 0.0.40
codegen_flags: <defaults>
</compile_context>

<pallas_src>
import jax
import jax.numpy as jnp
from jax.experimental import pallas as pl
from jax.experimental.pallas import tpu as pltpu


def _make_outconv_kernel(cin, cout):
    """Kernel body: o[co, p] = b[co] + sum_ci w[co, ci] * x[ci, p]."""

    def kernel(w_ref, b_ref, x_ref, o_ref):
        # w_ref: SMEM (cout, cin) f32   (scalar weights)
        # b_ref: SMEM (cout,)     f32   (scalar bias)
        # x_ref: VMEM (cin, TP)         (channels on sublanes, pixels on lanes)
        # o_ref: VMEM (cout, TP)        (lane-dense output tile)
        tp = x_ref.shape[-1]
        x = x_ref[...].astype(jnp.float32)
        rows = []
        for co in range(cout):                       # unrolled (cout is tiny)
            acc = jnp.full((1, tp), b_ref[co], dtype=jnp.float32)
            for ci in range(cin):                    # unrolled VPU FMA
                acc = acc + w_ref[co, ci] * x[ci:ci + 1, :]
            rows.append(acc)
        o_ref[...] = jnp.concatenate(rows, axis=0).astype(o_ref.dtype)

    return kernel


def outconv_pallas(x_nchw, weight, bias, *, max_pixels_per_tile=8192):
    """1x1 Conv2d forward (matches nn.Conv2d(in, out, kernel_size=1)).

    x_nchw : (N, Cin, H, W)
    weight : (Cout, Cin, 1, 1)   (PyTorch layout)
    bias   : (Cout,)
    returns: (N, Cout, H, W)
    """
    N, Cin, H, W = x_nchw.shape
    Cout = weight.shape[0]
    HW = H * W

    # Free reshapes only — no data movement, channels stay on sublanes.
    x3d = x_nchw.reshape(N, Cin, HW)
    w2d = weight.reshape(Cout, Cin).astype(jnp.float32)
    b1d = bias.astype(jnp.float32)

    # Pixel tile (lane axis): either the whole HW row (always a legal block)
    # or a large multiple of 128, capped so double-buffered in+out tiles stay
    # comfortably inside every generation's scoped VMEM default.
    vmem_budget_bytes = 8 * 1024 * 1024
    tp_cap = max(128, vmem_budget_bytes // (2 * (Cin + Cout) * 4))
    tp_cap = min(max_pixels_per_tile, tp_cap)
    if HW <= tp_cap:
        tp = HW                       # full row: legal block, single pixel tile
    else:
        tp = (tp_cap // 128) * 128    # multiple of 128; partial last tile OK
    grid = (N, pl.cdiv(HW, tp))

    kernel = _make_outconv_kernel(Cin, Cout)

    out3d = pl.pallas_call(
        kernel,
        out_shape=jax.ShapeDtypeStruct((N, Cout, HW), x_nchw.dtype),
        grid=grid,
        in_specs=[
            pl.BlockSpec(memory_space=pltpu.MemorySpace.SMEM),   # weight scalars
            pl.BlockSpec(memory_space=pltpu.MemorySpace.SMEM),   # bias scalars
            pl.BlockSpec((None, Cin, tp), lambda n, p: (n, 0, p)),
        ],
        out_specs=pl.BlockSpec((None, Cout, tp), lambda n, p: (n, 0, p)),
        compiler_params=pltpu.CompilerParams(
            dimension_semantics=("parallel", "parallel")),
    )(w2d, b1d, x3d)

    # Free reshape back to NCHW.
    return out3d.reshape(N, Cout, H, W)


if __name__ == "__main__":
    # OutConv(in_channels=4, out_channels=3) on x of shape (2, 4, 16, 16)
    N, Cin, Cout, H, W = 2, 4, 3, 16, 16

    key = jax.random.PRNGKey(0)
    kx, kw, kb = jax.random.split(key, 3)

    x = jax.random.normal(kx, (N, Cin, H, W), dtype=jnp.float32)
    # Deterministic parameter init (Conv2d(4, 3, kernel_size=1) shapes).
    bound = 1.0 / (Cin ** 0.5)  # PyTorch uniform bound, fan_in = Cin*1*1
    weight = jax.random.uniform(kw, (Cout, Cin, 1, 1), minval=-bound,
                                maxval=bound, dtype=jnp.float32)
    bias = jax.random.uniform(kb, (Cout,), minval=-bound, maxval=bound,
                              dtype=jnp.float32)

    y = outconv_pallas(x, weight, bias)
    y = jax.block_until_ready(y)

    # Cross-check against plain-JAX 1x1 conv reference.
    ref = jnp.einsum("nchw,oc->nohw", x, weight.reshape(Cout, Cin)) \
          + bias.reshape(1, Cout, 1, 1)
    assert y.shape == (N, Cout, H, W)
    assert jnp.allclose(y, ref, atol=1e-5, rtol=1e-5)

    print("KERNEL_OK")
</pallas_src>

<mosaic_0001>
module attributes {stable_mosaic.version = 11 : i64} {
  func.func @kernel(%arg0: i32, %arg1: i32, %arg2: memref<3x4xf32, #tpu.memory_space<smem>>, %arg3: memref<3xf32, #tpu.memory_space<smem>>, %arg4: memref<1x4x256xf32, #tpu.memory_space<vmem>>, %arg5: memref<1x3x256xf32, #tpu.memory_space<vmem>>) attributes {dimension_semantics = [#tpu.dimension_semantics<parallel>, #tpu.dimension_semantics<parallel>], iteration_bounds = array<i64: 2, 1>, scalar_prefetch = 0 : i64, scratch_operands = 0 : i64, tpu.core_type = #tpu.core_type<tc>, window_params = [{transform_indices = @transform_0, window_bounds = array<i64: 3, 4>}, {transform_indices = @transform_1, window_bounds = array<i64: 3>}, {transform_indices = @transform_2, window_bounds = array<i64: 1, 4, 256>}, {transform_indices = @transform_3, window_bounds = array<i64: 1, 3, 256>}]} {
    %c0 = arith.constant 0 : index
    %c0_0 = arith.constant 0 : index
    %c0_1 = arith.constant 0 : index
    %0 = vector.load %arg4[%c0, %c0_0, %c0_1] : memref<1x4x256xf32, #tpu.memory_space<vmem>>, vector<1x4x256xf32>
    %1 = vector.shape_cast %0 : vector<1x4x256xf32> to vector<4x256xf32>
    %c0_2 = arith.constant 0 : index
    %2 = memref.load %arg3[%c0_2] : memref<3xf32, #tpu.memory_space<smem>>
    %3 = vector.broadcast %2 : f32 to vector<1x256xf32>
    %c0_3 = arith.constant 0 : index
    %c0_4 = arith.constant 0 : index
    %4 = memref.load %arg2[%c0_3, %c0_4] : memref<3x4xf32, #tpu.memory_space<smem>>
    %5 = vector.extract_strided_slice %1 {offsets = [0, 0], sizes = [1, 256], strides = [1, 1]} : vector<4x256xf32> to vector<1x256xf32>
    %6 = vector.broadcast %4 : f32 to vector<1x256xf32>
    %7 = arith.mulf %6, %5 : vector<1x256xf32>
    %8 = arith.addf %3, %7 : vector<1x256xf32>
    %c0_5 = arith.constant 0 : index
    %c1 = arith.constant 1 : index
    %9 = memref.load %arg2[%c0_5, %c1] : memref<3x4xf32, #tpu.memory_space<smem>>
    %10 = vector.extract_strided_slice %1 {offsets = [1, 0], sizes = [1, 256], strides = [1, 1]} : vector<4x256xf32> to vector<1x256xf32>
    %11 = vector.broadcast %9 : f32 to vector<1x256xf32>
    %12 = arith.mulf %11, %10 : vector<1x256xf32>
    %13 = arith.addf %8, %12 : vector<1x256xf32>
    %c0_6 = arith.constant 0 : index
    %c2 = arith.constant 2 : index
    %14 = memref.load %arg2[%c0_6, %c2] : memref<3x4xf32, #tpu.memory_space<smem>>
    %15 = vector.extract_strided_slice %1 {offsets = [2, 0], sizes = [1, 256], strides = [1, 1]} : vector<4x256xf32> to vector<1x256xf32>
    %16 = vector.broadcast %14 : f32 to vector<1x256xf32>
    %17 = arith.mulf %16, %15 : vector<1x256xf32>
    %18 = arith.addf %13, %17 : vector<1x256xf32>
    %c0_7 = arith.constant 0 : index
    %c3 = arith.constant 3 : index
    %19 = memref.load %arg2[%c0_7, %c3] : memref<3x4xf32, #tpu.memory_space<smem>>
    %20 = vector.extract_strided_slice %1 {offsets = [3, 0], sizes = [1, 256], strides = [1, 1]} : vector<4x256xf32> to vector<1x256xf32>
    %21 = vector.broadcast %19 : f32 to vector<1x256xf32>
    %22 = arith.mulf %21, %20 : vector<1x256xf32>
    %23 = arith.addf %18, %22 : vector<1x256xf32>
    %c1_8 = arith.constant 1 : index
    %24 = memref.load %arg3[%c1_8] : memref<3xf32, #tpu.memory_space<smem>>
    %25 = vector.broadcast %24 : f32 to vector<1x256xf32>
    %c1_9 = arith.constant 1 : index
    %c0_10 = arith.constant 0 : index
    %26 = memref.load %arg2[%c1_9, %c0_10] : memref<3x4xf32, #tpu.memory_space<smem>>
    %27 = vector.extract_strided_slice %1 {offsets = [0, 0], sizes = [1, 256], strides = [1, 1]} : vector<4x256xf32> to vector<1x256xf32>
    %28 = vector.broadcast %26 : f32 to vector<1x256xf32>
    %29 = arith.mulf %28, %27 : vector<1x256xf32>
    %30 = arith.addf %25, %29 : vector<1x256xf32>
    %c1_11 = arith.constant 1 : index
    %c1_12 = arith.constant 1 : index
    %31 = memref.load %arg2[%c1_11, %c1_12] : memref<3x4xf32, #tpu.memory_space<smem>>
    %32 = vector.extract_strided_slice %1 {offsets = [1, 0], sizes = [1, 256], strides = [1, 1]} : vector<4x256xf32> to vector<1x256xf32>
    %33 = vector.broadcast %31 : f32 to vector<1x256xf32>
    %34 = arith.mulf %33, %32 : vector<1x256xf32>
    %35 = arith.addf %30, %34 : vector<1x256xf32>
    %c1_13 = arith.constant 1 : index
    %c2_14 = arith.constant 2 : index
    %36 = memref.load %arg2[%c1_13, %c2_14] : memref<3x4xf32, #tpu.memory_space<smem>>
    %37 = vector.extract_strided_slice %1 {offsets = [2, 0], sizes = [1, 256], strides = [1, 1]} : vector<4x256xf32> to vector<1x256xf32>
    %38 = vector.broadcast %36 : f32 to vector<1x256xf32>
    %39 = arith.mulf %38, %37 : vector<1x256xf32>
    %40 = arith.addf %35, %39 : vector<1x256xf32>
    %c1_15 = arith.constant 1 : index
    %c3_16 = arith.constant 3 : index
    %41 = memref.load %arg2[%c1_15, %c3_16] : memref<3x4xf32, #tpu.memory_space<smem>>
    %42 = vector.extract_strided_slice %1 {offsets = [3, 0], sizes = [1, 256], strides = [1, 1]} : vector<4x256xf32> to vector<1x256xf32>
    %43 = vector.broadcast %41 : f32 to vector<1x256xf32>
    %44 = arith.mulf %43, %42 : vector<1x256xf32>
    %45 = arith.addf %40, %44 : vector<1x256xf32>
    %c2_17 = arith.constant 2 : index
    %46 = memref.load %arg3[%c2_17] : memref<3xf32, #tpu.memory_space<smem>>
    %47 = vector.broadcast %46 : f32 to vector<1x256xf32>
    %c2_18 = arith.constant 2 : index
    %c0_19 = arith.constant 0 : index
    %48 = memref.load %arg2[%c2_18, %c0_19] : memref<3x4xf32, #tpu.memory_space<smem>>
    %49 = vector.extract_strided_slice %1 {offsets = [0, 0], sizes = [1, 256], strides = [1, 1]} : vector<4x256xf32> to vector<1x256xf32>
    %50 = vector.broadcast %48 : f32 to vector<1x256xf32>
    %51 = arith.mulf %50, %49 : vector<1x256xf32>
    %52 = arith.addf %47, %51 : vector<1x256xf32>
    %c2_20 = arith.constant 2 : index
    %c1_21 = arith.constant 1 : index
    %53 = memref.load %arg2[%c2_20, %c1_21] : memref<3x4xf32, #tpu.memory_space<smem>>
    %54 = vector.extract_strided_slice %1 {offsets = [1, 0], sizes = [1, 256], strides = [1, 1]} : vector<4x256xf32> to vector<1x256xf32>
    %55 = vector.broadcast %53 : f32 to vector<1x256xf32>
    %56 = arith.mulf %55, %54 : vector<1x256xf32>
    %57 = arith.addf %52, %56 : vector<1x256xf32>
    %c2_22 = arith.constant 2 : index
    %c2_23 = arith.constant 2 : index
    %58 = memref.load %arg2[%c2_22, %c2_23] : memref<3x4xf32, #tpu.memory_space<smem>>
    %59 = vector.extract_strided_slice %1 {offsets = [2, 0], sizes = [1, 256], strides = [1, 1]} : vector<4x256xf32> to vector<1x256xf32>
    %60 = vector.broadcast %58 : f32 to vector<1x256xf32>
    %61 = arith.mulf %60, %59 : vector<1x256xf32>
    %62 = arith.addf %57, %61 : vector<1x256xf32>
    %c2_24 = arith.constant 2 : index
    %c3_25 = arith.constant 3 : index
    %63 = memref.load %arg2[%c2_24, %c3_25] : memref<3x4xf32, #tpu.memory_space<smem>>
    %64 = vector.extract_strided_slice %1 {offsets = [3, 0], sizes = [1, 256], strides = [1, 1]} : vector<4x256xf32> to vector<1x256xf32>
    %65 = vector.broadcast %63 : f32 to vector<1x256xf32>
    %66 = arith.mulf %65, %64 : vector<1x256xf32>
    %67 = arith.addf %62, %66 : vector<1x256xf32>
    %68 = tpu.concatenate %23, %45, %67 in 0 : vector<1x256xf32>, vector<1x256xf32>, vector<1x256xf32> -> vector<3x256xf32>
    %c0_26 = arith.constant 0 : index
    %c0_27 = arith.constant 0 : index
    %c0_28 = arith.constant 0 : index
    %69 = vector.load %arg5[%c0_26, %c0_27, %c0_28] : memref<1x3x256xf32, #tpu.memory_space<vmem>>, vector<1x3x256xf32>
    %70 = vector.shape_cast %69 : vector<1x3x256xf32> to vector<3x256xf32>
    %71 = vector.shape_cast %68 : vector<3x256xf32> to vector<1x3x256xf32>
    tpu.vector_store %arg5[%c0_26, %c0_27, %c0_28], %71 {strides = array<i32>} : memref<1x3x256xf32, #tpu.memory_space<vmem>>, vector<1x3x256xf32>,
    return
  }
  func.func @transform_0(%arg0: i32, %arg1: i32) -> (i32, i32) {
    %c0_i32 = arith.constant 0 : i32
    %c0_i32_0 = arith.constant 0 : i32
    %c0_i32_1 = arith.constant 0 : i32
    return %c0_i32, %c0_i32_0 : i32, i32
  }
  func.func @transform_1(%arg0: i32, %arg1: i32) -> i32 {
    %c0_i32 = arith.constant 0 : i32
    %c0_i32_0 = arith.constant 0 : i32
    return %c0_i32 : i32
  }
  func.func @transform_2(%arg0: i32, %arg1: i32) -> (i32, i32, i32) {
    %c0_i32 = arith.constant 0 : i32
    %c0_i32_0 = arith.constant 0 : i32
    return %arg0, %c0_i32, %arg1 : i32, i32, i32
  }
  func.func @transform_3(%arg0: i32, %arg1: i32) -> (i32, i32, i32) {
    %c0_i32 = arith.constant 0 : i32
    %c0_i32_0 = arith.constant 0 : i32
    return %arg0, %c0_i32, %arg1 : i32, i32, i32
  }
}

</mosaic_0001>

<bundles_post_ra>
// kernel: tpu_custom_call.1
= control target key start
LH: loop header
LB: loop body
LE: loop exit
PB: predicated region body
PF: predicated region fallthrough
CT: control target
= control target key end

     0   :  { %8 = vsyncpa [#allocation4], 0  ;;  %s948_s0 = inlined_call_operand.hbm [shape: f32[3,4], index: 0, kind: input, shape index: {}]   ;;  %s949_s1 = inlined_call_operand.vmem [shape: f32[3], index: 1, kind: input, shape index: {}]   ;;  %s950_s2 = inlined_call_operand.hbm [shape: f32[2,4,256], index: 2, kind: input, shape index: {}]   ;;  %s951_s3 = inlined_call_operand.vmem [shape: f32[2,3,256], index: 3, kind: output, shape index: {}]  }
   0x1   :  { %9 = vsyncpa [#allocation5], 0 }
   0x2   :  { %10 = vsyncpa [#allocation3], 0 }
   0x3   :  { %12 = vsyncpa [#allocation3 + $0x1], 0  ;;  %s754_s12 = smov 0   ;;  %s756_s13 = smov 0  }
   0x4   :  { %s758_s14 = smov 0   ;;  %s760_s15 = smov 0  }
   0x5   :  { %s762_s16 = smov 0   ;;  %s764_s17 = smov 0  }
   0x6 LB: > { %s496_s18 = sadd.s32 4294967295, %s729_s17   ;;  %p94_p0 = scmp.ne.s32.totalorder %s713_s13, %s709_s12  ;;  %s729_s17 = sphi %s764_s17, %s18_s17   ;;  %s725_s16 = sphi %s762_s16, %s967_s16   ;;  %s721_s15 = sphi %s760_s15, %s966_s15   ;;  %s717_s14 = sphi %s758_s14, %s965_s14   ;;  %s713_s13 = sphi %s756_s13, %s964_s13   ;;  %s709_s12 = sphi %s754_s12, %s963_s12  }
   0x7   : > { %p784_p1 = scmp.eq.s32.totalorder %s496_s18, 0  ;;  %p498_p2 = scmp.ge.s32.totalorder %s729_s17, 1 }
   0x8   : > { %p133_p3 = scmp.lt.s32.totalorder %s729_s17, 3  ;;  %s155_s24 = sshll.u32 %s949_s1, 4  ;;  %s156_s24 = int_to_ptr.vmem [resolvable:$true] %s155_s24 }
   0x9   : > { %s955_s19 = scalar_select %p784_p1, 1, 0 }
   0xa   : > { %p792_p4 = por %p784_p1, %p94_p0  ;;  %p796_p5 = pnand %p498_p2, %p133_p3 }
   0xb   : > { %s30_s26 = sadd.s32 1, %s725_s16  ;;  %s613_s30 = scalar_lea.hbm %s948_s0, 64 }
   0xc   : > { %s956_s20 = scalar_select %p792_p4, 1, 0 }
   0xd   : > { %p547_p6 = pneg %p796_p5  ;;  %p812_p8 = scmp.ge.s32.totalorder %s30_s26, 2 }
   0xe   : > { %p614_p9 = scmp.ne.s32.totalorder %s948_s0, %s613_s30  ;;  %p620_p13 = scmp.lt.u32.totalorder %s613_s30, %s948_s0 }
   0xf   : > { %p807_p7 = pnand %p547_p6, %p784_p1 }
  0x11   : > { %p615_p10 = pneg %p807_p7 }
  0x13   : > { %p616_p11 = pnand %p615_p10, %p614_p9 }
  0x15   : > { %p617_p12 = pneg %p616_p11 }
  0x17   : > { %p622_p0 = pnand %p620_p13, %p617_p12 }
  0x19   : > { %625 = shalt.err (!%p622_p0)
}
  0x1a   : > { %s731_s8 = smov [#allocation2]   ;;  %s626_s11 = scalar_lea.vmem %s156_s24, 16 }
  0x1b   : > { %550 = dma.hbm_to_smem (!%p807_p7), %s948_s0, 64, %s731_s8, [#allocation4]  }
  0x1c   : > { %p627_p2 = scmp.ne.s32.totalorder %s156_s24, %s626_s11  ;;  %p634_p4 = scmp.lt.s32.totalorder %s156_s24, %s156_s24 }
  0x1d   : > { %p635_p9 = scmp.lt.s32.totalorder %s626_s11, %s626_s11 }
  0x1e   : > { %p629_p3 = pnand %p627_p2, %p615_p10 }
  0x1f   : > { %p636_p11 = por %p635_p9, %p634_p4 }
  0x20   : > { %p630_p6 = pneg %p629_p3 }
  0x22   : > { %p637_p1 = pnand %p636_p11, %p630_p6 }
  0x24   : > { %640 = shalt.err (!%p637_p1)
}
  0x25   : > { %s732_s12 = smov [#allocation6]   ;;  %s969_s26 = smov (%p812_p8, %s30_s26), 0 }
  0x26   : > { %553 = dma.vmem_to_smem (!%p807_p7), %s156_s24, 16, %s732_s12, [#allocation5]  }
  0x27   : > { %s81_s18 = sadd.s32 1, %s717_s14  ;;  %p88_p1 = scmp.ne.s32.totalorder %s717_s14, %s713_s13 }
  0x28   : > { %s76_s22 = ssub.s32 %s725_s16, %s969_s26  ;;  %p89_p4 = scmp.eq.s32.totalorder %s729_s17, 0 }
  0x29   : > { %p79_p10 = scmp.eq.s32.totalorder %s76_s22, 0  ;;  %p560_p12 = scmp.lt.s32.totalorder %s729_s17, 2 }
  0x2a   : > { %p90_p13 = por %p89_p4, %p88_p1  ;;  %s166_s23 = sand.u32 1, %s717_s14  }
  0x2b   : > { %s847_s25 = scalar_select %p79_p10, %s717_s14, %s81_s18  }
  0x2c   : > { %s502_s28 = sshll.u32 %s166_s23, 3  ;;  %s535_s29 = sshll.u32 %s725_s16, 7 }
  0x2d   : > { %s853_s24 = scalar_lea.hbm %s950_s2, %s535_s29  ;;  %s170_s27 = scalar_lea.vmem [#allocation7], %s502_s28 }
  0x2e   : > { %s180_s5 = sshll.u32 %s170_s27, 4  ;;  %p857_p7 = pnand %p560_p12, %p90_p13  ;;  %s855_s5 = int_to_ptr.vmem [resolvable:$true] %s180_s5 }
  0x2f   : > { %s167_s7 = scalar_lea.sflag [#allocation3], %s166_s23  ;;  %s641_s8 = scalar_lea.hbm %s853_s24, 128 }
  0x30   : > { %p642_p8 = scmp.ne.s32.totalorder %s853_s24, %s641_s8  ;;  %p643_p0 = pneg %p857_p7 }
  0x31   : > { %s646_s11 = scalar_lea.hbm %s950_s2, 256  ;;  %p647_p6 = scmp.lt.u32.totalorder %s853_s24, %s950_s2 }
  0x32   : > { %p644_p2 = pnand %p643_p0, %p642_p8  ;;  %p648_p9 = scmp.lt.u32.totalorder %s646_s11, %s641_s8 }
  0x33   : > { %p650_p1 = scmp.lt.u32.totalorder %s641_s8, %s853_s24 }
  0x34   : > { %p645_p3 = pneg %p644_p2  ;;  %p649_p11 = por %p648_p9, %p647_p6 }
  0x36   : > { %p651_p4 = por %p650_p1, %p649_p11 }
  0x38   : > { %p652_p10 = pnand %p651_p4, %p645_p3 }
  0x3a   : > { %655 = shalt.err (!%p652_p10)
}
  0x3b   : > { %s656_s22 = scalar_lea.vmem %s855_s5, 128  ;;  %s733_s23 = smov [#allocation7]  }
  0x3c   : > { %p657_p12 = scmp.ne.s32.totalorder %s855_s5, %s656_s22  ;;  %s661_s28 = sshll.u32 %s733_s23, 4  ;;  %s662_s28 = int_to_ptr.vmem [resolvable:$false] %s661_s28 }
  0x3d   : > { %s663_s29 = scalar_lea.vmem %s662_s28, 256  ;;  %p664_p2 = scmp.lt.s32.totalorder %s855_s5, %s662_s28 }
  0x3e   : > { %p659_p13 = pnand %p657_p12, %p643_p0  ;;  %p665_p6 = scmp.lt.s32.totalorder %s663_s29, %s656_s22 }
  0x40   : > { %p660_p8 = pneg %p659_p13  ;;  %p666_p9 = por %p665_p6, %p664_p2 }
  0x42   : > { %p667_p11 = pnand %p666_p9, %p660_p8 }
  0x44   : > { %670 = shalt.err (!%p667_p11)
}
  0x45   : > { %557 = dma.hbm_to_vmem [thread:$0]  (!%p857_p7), %s853_s24, 128, %s855_s5, %s167_s7  }
  0x46   : > { %189 = sbr.rel (%p796_p5) target bundleno = 116 (0x74), region = 32  ;;  %p961_p0 = scmp.ne.s32.totalorder (!%p796_p5), %s955_s19, 0 }
  0x4d   : > { %696 = dma.done.wait (%p961_p0), [#allocation4], 64  }
  0x4e   : > { %698 = vsyncadd (%p961_p0), [#allocation4], 4294967232 }
  0x4f   : > { %700 = dma.done.wait (%p961_p0), [#allocation5], 16  }
  0x50   : > { %702 = vsyncadd (%p961_p0), [#allocation5], 4294967280  ;;  %s199_s30 = sand.u32 1, %s713_s13   ;;  %p962_p7 = scmp.ne.s32.totalorder %s956_s20, 0 }
  0x51   : > { %s508_s4 = sshll.u32 %s199_s30, 3  ;;  %s200_s24 = scalar_lea.sflag [#allocation3], %s199_s30 }
  0x52   : > { %s203_s27 = scalar_lea.vmem [#allocation7], %s508_s4 }
  0x53   : > { %704 = dma.done.wait (%p962_p7), %s200_s24, 128  }
  0x54   : > { %706 = vsyncadd (%p962_p7), %s200_s24, 4294967168 }
  0x55   : > { %208 = sfence }
  0x56   : > { %s243_s21 = sld [smem:[#allocation6]]  ;;  %s511_s6 = sld [smem:[#allocation2 + $0x1]]  ;;  %v334_v0 = vlaneseq  ;;  %v242_v1 = vld [vmem:[%s203_s27] sm:$0xff]  ;;  %vm366_vm0 = vcmask 1040384   ;;  %vm369_vm1 = vcmask 1041408  }
  0x57   : > { %s245_s5 = sld [smem:[#allocation2]]  ;;  %s513_s7 = sld [smem:[#allocation2 + $0x2]] }
  0x58   : > { %s515_s8 = sld [smem:[#allocation2 + $0x3]]  ;;  %s901_s19 = sld [smem:[#allocation6 + $0x1]]  ;;  %v335_v5 = vshrl.u32 %v334_v0, 7 }
  0x59   : > { %s518_s9 = sld [smem:[#allocation2 + $0x80]]  ;;  %s903_s10 = sld [smem:[#allocation2 + $0x81]] }
  0x5a   : > { %s905_s11 = sld [smem:[#allocation2 + $0x82]]  ;;  %s523_s20 = sld [smem:[#allocation2 + $0x83]]  ;;  %v336_v16 = vsub.s32 0, %v335_v5  ;;  %v340_v36 = vsub.s32 4, %v335_v5 }
  0x5b   : > { %s907_s12 = sld [smem:[#allocation6 + $0x2]]  ;;  %s909_s18 = sld [smem:[#allocation2 + $0x100]] }
  0x5c   : > { %v244_v2 = vstv %s243_s21  ;;  %v250_v4 = vstv %s511_s6  ;;  %s911_s22 = sld [smem:[#allocation2 + $0x101]]  ;;  %s913_s23 = sld [smem:[#allocation2 + $0x102]] }
  0x5d   : > { %v246_v3 = vstv %s245_s5  ;;  %v251_v7 = vmul.f32 %v250_v4, %v242_v1  ;;  %v258_v8 = vstv %s513_s7  ;;  %s915_s28 = sld [smem:[#allocation2 + $0x103]]  ;;  %p233_p5 = scmp.lt.s32.totalorder %s721_s15, 1 }
  0x5e   : > { %v247_v6 = vmul.f32 %v246_v3, %v242_v1  ;;  %v266_v9 = vstv %s515_s8  ;;  %v259_v12 = vmul.f32 %v258_v8, %v242_v1  ;;  %v274_v14 = vstv %s901_s19 }
  0x5f   : > { %v512_v11 = vrot.slane %v251_v7, 9  ;;  %v267_v13 = vmul.f32 %v266_v9, %v242_v1  ;;  %v276_v15 = vstv %s518_s9  ;;  %v280_v21 = vstv %s903_s10  ;;  %s971_s15 = smov (!%p233_p5, %s721_s15), 1 }
  0x60   : > { %v248_v10 = vadd.f32 %v247_v6, %v244_v2  ;;  %v514_v18 = vrot.slane %v259_v12, 10  ;;  %v277_v20 = vmul.f32 %v276_v15, %v242_v1  ;;  %v288_v22 = vstv %s905_s11  ;;  %s536_s29 = sshll.u32 %s971_s15, 3 }
  0x61   : > { %v516_v19 = vrot.slane %v267_v13, 11  ;;  %v296_v23 = vstv %s523_s20  ;;  %v304_v24 = vstv %s907_s12  ;;  %v281_v27 = vmul.f32 %v280_v21, %v242_v1  ;;  %s240_s24 = scalar_lea.vmem %s951_s3, %s536_s29 }
  0x62   : > { %v256_v17 = vadd.f32 %v512_v11, %v248_v10  ;;  %v278_v26 = vadd.f32 %v277_v20, %v274_v14  ;;  %v289_v28 = vmul.f32 %v288_v22, %v242_v1  ;;  %v297_v29 = vmul.f32 %v296_v23, %v242_v1 }
  0x63   : > { %v306_v30 = vstv %s909_s18  ;;  %v310_v31 = vstv %s911_s22  ;;  %v318_v32 = vstv %s913_s23  ;;  %v520_v33 = vrot.slane %v281_v27, 9 }
  0x64   : > { %v264_v25 = vadd.f32 %v514_v18, %v256_v17  ;;  %v522_v34 = vrot.slane %v289_v28, 10  ;;  %v307_v35 = vmul.f32 %v306_v30, %v242_v1  ;;  %v311_v38 = vmul.f32 %v310_v31, %v242_v1 }
  0x65   : > { %v319_v39 = vmul.f32 %v318_v32, %v242_v1  ;;  %v326_v40 = vstv %s915_s28  ;;  %v286_v41 = vadd.f32 %v520_v33, %v278_v26  ;;  %v524_v42 = vrot.slane %v297_v29, 11 }
  0x66   : > { %v272_v37 = vadd.f32 %v516_v19, %v264_v25  ;;  %v308_v43 = vadd.f32 %v307_v35, %v304_v24  ;;  %v327_v44 = vmul.f32 %v326_v40, %v242_v1  ;;  %v528_v45 = vrot.slane %v311_v38, 9 }
  0x67   : > { %v530_v46 = vrot.slane %v319_v39, 10  ;;  %v294_v47 = vadd.f32 %v522_v34, %v286_v41 }
  0x68   : > { %v316_v48 = vadd.f32 %v528_v45, %v308_v43  ;;  %v532_v49 = vrot.slane %v327_v44, 11  ;;  %v337_v51 = vrot.slane %v272_v37, %v336_v16  ;;  %v341_v52 = vrot.slane %v272_v37, %v340_v36 }
  0x69   : > { %v302_v50 = vadd.f32 %v524_v42, %v294_v47 }
  0x6a   : > { %v324_v53 = vadd.f32 %v530_v46, %v316_v48 }
  0x6b   : > { %v348_v54 = vrot.slane %v302_v50, %v336_v16  ;;  %v352_v55 = vrot.slane %v302_v50, %v340_v36 }
  0x6c   : > { %v332_v56 = vadd.f32 %v532_v49, %v324_v53 }
  0x6d   : > { %v367_v57 = vsel %vm366_vm0, %v337_v51, %v348_v54  ;;  %v368_v58 = vsel %vm366_vm0, %v341_v52, %v352_v55 }
  0x6e   : > { %v359_v59 = vrot.slane %v332_v56, %v336_v16  ;;  %v363_v60 = vrot.slane %v332_v56, %v340_v36 }
  0x70   : > { %v370_v61 = vsel %vm369_vm1, %v367_v57, %v359_v59  ;;  %v371_v62 = vsel %vm369_vm1, %v368_v58, %v363_v60 }
  0x71   : > { %v374_v63 = vcombine.low %v370_v61, %v371_v62 }
  0x73   : > { %376 = vst [vmem:[%s240_s24] sm:$0x77] %v374_v63 }
  0x74 PF: > { %s18_s17 = sadd.s32 1, %s729_s17   ;;  %s963_s12 = smov %s713_s13 }
  0x75   : > { %p15_p3 = scmp.ge.s32.totalorder %s18_s17, 4   ;;  %s964_s13 = smov %s717_s14 }
  0x76   : > { %s965_s14 = smov %s847_s25  ;;  %s966_s15 = smov %s725_s16 }
  0x77   : > { %s967_s16 = smov %s969_s26  ;;  %17 = sbr.rel (!%p15_p3) target bundleno = 6 (0x6), region = 82 }
  0x7e   :  { %407 = vsyncpa [#allocation3], 1 }
  0x7f   :  { %409 = vsyncpa [#allocation3 + $0x1], 1 }
  0x80   :  { %410 = vsyncpa [#allocation4], 1 }
  0x81   :  { %412 = vsyncpa [#allocation4 + $0x1], 1 }
  0x82   :  { %413 = vsyncpa [#allocation5], 1 }
  0x83   :  { %415 = vsyncpa [#allocation5 + $0x1], 1 }

</bundles_post_ra>
